<compile_context>
chip_gen: v7x
topology: tpu7x:2x2x1
jax: 0.10.0
libtpu: 0.0.40
codegen_flags: <defaults>
</compile_context>

<pallas_src>
import functools

import jax
import jax.numpy as jnp
from jax.experimental import pallas as pl
from jax.experimental.pallas import tpu as pltpu

LANE = 128


def _round_up(x, m):
    return ((x + m - 1) // m) * m


def _mlp_readout_kernel(x_ref, *refs, n_layers):
    # refs = (w0, w1, ..., w_{n_layers-1}, bias_packed, out_ref)
    out_ref = refs[-1]
    b_ref = refs[-2]
    w_refs = refs[:n_layers]

    y = x_ref[...]                                   # (TM, in_dim), input dtype
    for l in range(n_layers):
        w = w_refs[l][...]                           # (in_pad, 128), input dtype
        b = b_ref[l:l + 1, :]                        # (1, 128), f32
        acc = jnp.dot(y, w, preferred_element_type=jnp.float32) + b
        if l < n_layers - 1:
            # ReLU on the f32 accumulator, downcast only for the next dot.
            y = jnp.maximum(acc, 0.0).astype(x_ref.dtype)
        else:
            y = acc
    out_ref[...] = y.astype(out_ref.dtype)


def mlp_readout(x, weights, biases, depth_of_mlp=3, tm=None):
    """x: (batch, input_dim). weights[l]: (in_l, out_l). biases[l]: (1, out_l)."""
    n_layers = depth_of_mlp + 1
    assert len(weights) == n_layers and len(biases) == n_layers
    batch, input_dim = x.shape
    out_dim = weights[-1].shape[1]
    dtype = x.dtype
    itemsize = jnp.dtype(dtype).itemsize

    # --- Lane-dense parameter packing (zero padding is mathematically inert) ---
    w_pad = []
    for l, w in enumerate(weights):
        in_d, out_d = w.shape
        in_pad = input_dim if l == 0 else LANE       # prev layer's padded width
        wp = jnp.zeros((in_pad, LANE), dtype).at[:in_d, :out_d].set(w.astype(dtype))
        w_pad.append(wp)

    n_rows = _round_up(n_layers, 8)
    b_pack = jnp.zeros((n_rows, LANE), jnp.float32)
    for l, b in enumerate(biases):
        b_pack = b_pack.at[l, :b.shape[-1]].set(
            b.reshape(-1).astype(jnp.float32))

    # --- Batch tiling (multiple of 8 rows; sized for v7x's smaller VMEM too) ---
    if tm is None:
        tm = min(1024, _round_up(batch, 8))
    tm = max(8, _round_up(tm, 8))
    batch_pad = _round_up(batch, tm)
    if batch_pad != batch:
        x = jnp.pad(x, ((0, batch_pad - batch), (0, 0)))
    grid = (batch_pad // tm,)

    # --- VMEM budget: double-buffered x/out tiles + resident params + headroom ---
    need = (2 * tm * input_dim * itemsize            # x tile, double buffered
            + 2 * tm * LANE * itemsize               # out tile, double buffered
            + 2 * sum(int(w.size) * itemsize for w in w_pad)
            + 2 * int(b_pack.size) * 4
            + 4 * tm * LANE)                         # f32 intermediate headroom
    vmem_limit = int(min(32 << 20, max(4 << 20, 2 * need)))

    flops = 2 * batch * sum(int(w.shape[0]) * int(w.shape[1]) for w in weights)
    bytes_accessed = (batch * input_dim * itemsize
                      + batch * out_dim * itemsize
                      + sum(int(w.size) * itemsize for w in w_pad)
                      + int(b_pack.size) * 4)
    cost = pl.CostEstimate(flops=flops, transcendentals=0,
                           bytes_accessed=bytes_accessed)

    in_specs = [pl.BlockSpec((tm, input_dim), lambda i: (i, 0))]
    for w in w_pad:                                  # resident: constant index_map
        in_specs.append(pl.BlockSpec(w.shape, lambda i: (0, 0)))
    in_specs.append(pl.BlockSpec(b_pack.shape, lambda i: (0, 0)))

    kernel = functools.partial(_mlp_readout_kernel, n_layers=n_layers)

    out_pad = pl.pallas_call(
        kernel,
        out_shape=jax.ShapeDtypeStruct((batch_pad, LANE), dtype),
        grid=grid,
        in_specs=in_specs,
        out_specs=pl.BlockSpec((tm, LANE), lambda i: (i, 0)),
        compiler_params=pltpu.CompilerParams(
            dimension_semantics=("parallel",),
            vmem_limit_bytes=vmem_limit),
        cost_estimate=cost,
    )(x, *w_pad, b_pack)

    return out_pad[:batch, :out_dim]


def init_mlp_readout_params(key, input_dim, output_dim, depth_of_mlp=3,
                            dtype=jnp.float32):
    """Deterministic init matching the PyTorch module's layer shapes.

    nn.Linear(in, out) default init: U(-1/sqrt(in), 1/sqrt(in)) for W and b.
    W stored as (in, out) (transposed vs. PyTorch's (out, in))."""
    dims = [input_dim // 2 ** l for l in range(depth_of_mlp + 1)] + [output_dim]
    weights, biases = [], []
    for l in range(depth_of_mlp + 1):
        in_d, out_d = dims[l], dims[l + 1]
        key, kw, kb = jax.random.split(key, 3)
        bound = 1.0 / (in_d ** 0.5)
        weights.append(jax.random.uniform(kw, (in_d, out_d), dtype, -bound, bound))
        biases.append(jax.random.uniform(kb, (1, out_d), dtype, -bound, bound))
    return weights, biases


def _reference(x, weights, biases, depth_of_mlp):
    y = x
    for l in range(depth_of_mlp):
        y = jnp.maximum(y @ weights[l] + biases[l], 0.0)
    return y @ weights[-1] + biases[-1]


if __name__ == "__main__":
    input_dim = 64
    output_dim = 4
    depth_of_mlp = 3

    key = jax.random.PRNGKey(0)
    key, kx1, kx2 = jax.random.split(key, 3)
    weights, biases = init_mlp_readout_params(key, input_dim, output_dim,
                                              depth_of_mlp)

    # Small exact-fit batch.
    x1 = jax.random.normal(kx1, (8, input_dim), jnp.float32)
    out1 = jax.block_until_ready(mlp_readout(x1, weights, biases, depth_of_mlp))
    ref1 = _reference(x1, weights, biases, depth_of_mlp)
    assert out1.shape == (8, output_dim)
    assert jnp.allclose(out1, ref1, atol=1e-5, rtol=1e-5)

    # Non-multiple batch exercises the row-padding + slicing path.
    x2 = jax.random.normal(kx2, (37, input_dim), jnp.float32)
    out2 = jax.block_until_ready(mlp_readout(x2, weights, biases, depth_of_mlp))
    ref2 = _reference(x2, weights, biases, depth_of_mlp)
    assert out2.shape == (37, output_dim)
    assert jnp.allclose(out2, ref2, atol=1e-5, rtol=1e-5)

    print("KERNEL_OK")
</pallas_src>

<mosaic_0001>
module attributes {stable_mosaic.version = 11 : i64} {
  func.func @_mlp_readout_kernel(%arg0: i32, %arg1: memref<8x64xf32, #tpu.memory_space<vmem>>, %arg2: memref<64x128xf32, #tpu.memory_space<vmem>>, %arg3: memref<128x128xf32, #tpu.memory_space<vmem>>, %arg4: memref<128x128xf32, #tpu.memory_space<vmem>>, %arg5: memref<128x128xf32, #tpu.memory_space<vmem>>, %arg6: memref<8x128xf32, #tpu.memory_space<vmem>>, %arg7: memref<8x128xf32, #tpu.memory_space<vmem>>) attributes {dimension_semantics = [#tpu.dimension_semantics<parallel>], iteration_bounds = array<i64: 1>, scalar_prefetch = 0 : i64, scratch_operands = 0 : i64, tpu.core_type = #tpu.core_type<tc>, window_params = [{transform_indices = @transform_0, window_bounds = array<i64: 8, 64>}, {pipeline_mode = #tpu.pipeline_mode<synchronous>, transform_indices = @transform_1, window_bounds = array<i64: 64, 128>}, {pipeline_mode = #tpu.pipeline_mode<synchronous>, transform_indices = @transform_2, window_bounds = array<i64: 128, 128>}, {pipeline_mode = #tpu.pipeline_mode<synchronous>, transform_indices = @transform_3, window_bounds = array<i64: 128, 128>}, {pipeline_mode = #tpu.pipeline_mode<synchronous>, transform_indices = @transform_4, window_bounds = array<i64: 128, 128>}, {pipeline_mode = #tpu.pipeline_mode<synchronous>, transform_indices = @transform_5, window_bounds = array<i64: 8, 128>}, {transform_indices = @transform_6, window_bounds = array<i64: 8, 128>}]} {
    %c0 = arith.constant 0 : index
    %c0_0 = arith.constant 0 : index
    %0 = vector.load %arg1[%c0, %c0_0] : memref<8x64xf32, #tpu.memory_space<vmem>>, vector<8x64xf32>
    %c0_1 = arith.constant 0 : index
    %c0_2 = arith.constant 0 : index
    %1 = vector.load %arg2[%c0_1, %c0_2] : memref<64x128xf32, #tpu.memory_space<vmem>>, vector<64x128xf32>
    %c0_3 = arith.constant 0 : index
    %c0_4 = arith.constant 0 : index
    %2 = vector.load %arg6[%c0_3, %c0_4] : memref<8x128xf32, #tpu.memory_space<vmem>>, vector<1x128xf32>
    %cst = arith.constant dense<0.000000e+00> : vector<8x128xf32>
    %3 = tpu.matmul %0, %1, %cst {dimension_numbers = #tpu.dot_dimension_numbers<[1], [0], [0], [1], [0, 0, 1, 1], [], []>} : vector<8x64xf32>, vector<64x128xf32>, vector<8x128xf32> -> vector<8x128xf32>
    %4 = vector.broadcast %2 : vector<1x128xf32> to vector<8x128xf32>
    %5 = arith.addf %3, %4 : vector<8x128xf32>
    %cst_5 = arith.constant 0.000000e+00 : f32
    %6 = vector.broadcast %cst_5 : f32 to vector<8x128xf32>
    %7 = arith.maximumf %5, %6 : vector<8x128xf32>
    %c0_6 = arith.constant 0 : index
    %c0_7 = arith.constant 0 : index
    %8 = vector.load %arg3[%c0_6, %c0_7] : memref<128x128xf32, #tpu.memory_space<vmem>>, vector<128x128xf32>
    %c1 = arith.constant 1 : index
    %c0_8 = arith.constant 0 : index
    %9 = vector.load %arg6[%c1, %c0_8] : memref<8x128xf32, #tpu.memory_space<vmem>>, vector<1x128xf32>
    %cst_9 = arith.constant dense<0.000000e+00> : vector<8x128xf32>
    %10 = tpu.matmul %7, %8, %cst_9 {dimension_numbers = #tpu.dot_dimension_numbers<[1], [0], [0], [1], [0, 0, 1, 1], [], []>} : vector<8x128xf32>, vector<128x128xf32>, vector<8x128xf32> -> vector<8x128xf32>
    %11 = vector.broadcast %9 : vector<1x128xf32> to vector<8x128xf32>
    %12 = arith.addf %10, %11 : vector<8x128xf32>
    %cst_10 = arith.constant 0.000000e+00 : f32
    %13 = vector.broadcast %cst_10 : f32 to vector<8x128xf32>
    %14 = arith.maximumf %12, %13 : vector<8x128xf32>
    %c0_11 = arith.constant 0 : index
    %c0_12 = arith.constant 0 : index
    %15 = vector.load %arg4[%c0_11, %c0_12] : memref<128x128xf32, #tpu.memory_space<vmem>>, vector<128x128xf32>
    %c2 = arith.constant 2 : index
    %c0_13 = arith.constant 0 : index
    %16 = vector.load %arg6[%c2, %c0_13] : memref<8x128xf32, #tpu.memory_space<vmem>>, vector<1x128xf32>
    %cst_14 = arith.constant dense<0.000000e+00> : vector<8x128xf32>
    %17 = tpu.matmul %14, %15, %cst_14 {dimension_numbers = #tpu.dot_dimension_numbers<[1], [0], [0], [1], [0, 0, 1, 1], [], []>} : vector<8x128xf32>, vector<128x128xf32>, vector<8x128xf32> -> vector<8x128xf32>
    %18 = vector.broadcast %16 : vector<1x128xf32> to vector<8x128xf32>
    %19 = arith.addf %17, %18 : vector<8x128xf32>
    %cst_15 = arith.constant 0.000000e+00 : f32
    %20 = vector.broadcast %cst_15 : f32 to vector<8x128xf32>
    %21 = arith.maximumf %19, %20 : vector<8x128xf32>
    %c0_16 = arith.constant 0 : index
    %c0_17 = arith.constant 0 : index
    %22 = vector.load %arg5[%c0_16, %c0_17] : memref<128x128xf32, #tpu.memory_space<vmem>>, vector<128x128xf32>
    %c3 = arith.constant 3 : index
    %c0_18 = arith.constant 0 : index
    %23 = vector.load %arg6[%c3, %c0_18] : memref<8x128xf32, #tpu.memory_space<vmem>>, vector<1x128xf32>
    %cst_19 = arith.constant dense<0.000000e+00> : vector<8x128xf32>
    %24 = tpu.matmul %21, %22, %cst_19 {dimension_numbers = #tpu.dot_dimension_numbers<[1], [0], [0], [1], [0, 0, 1, 1], [], []>} : vector<8x128xf32>, vector<128x128xf32>, vector<8x128xf32> -> vector<8x128xf32>
    %25 = vector.broadcast %23 : vector<1x128xf32> to vector<8x128xf32>
    %26 = arith.addf %24, %25 : vector<8x128xf32>
    %c0_20 = arith.constant 0 : index
    %c0_21 = arith.constant 0 : index
    %27 = vector.load %arg7[%c0_20, %c0_21] : memref<8x128xf32, #tpu.memory_space<vmem>>, vector<8x128xf32>
    tpu.vector_store %arg7[%c0_20, %c0_21], %26 {strides = array<i32>} : memref<8x128xf32, #tpu.memory_space<vmem>>, vector<8x128xf32>,
    return
  }
  func.func @transform_0(%arg0: i32) -> (i32, i32) {
    %c0_i32 = arith.constant 0 : i32
    %c0_i32_0 = arith.constant 0 : i32
    return %arg0, %c0_i32 : i32, i32
  }
  func.func @transform_1(%arg0: i32) -> (i32, i32) {
    %c0_i32 = arith.constant 0 : i32
    %c0_i32_0 = arith.constant 0 : i32
    %c0_i32_1 = arith.constant 0 : i32
    return %c0_i32, %c0_i32_0 : i32, i32
  }
  func.func @transform_2(%arg0: i32) -> (i32, i32) {
    %c0_i32 = arith.constant 0 : i32
    %c0_i32_0 = arith.constant 0 : i32
    %c0_i32_1 = arith.constant 0 : i32
    return %c0_i32, %c0_i32_0 : i32, i32
  }
  func.func @transform_3(%arg0: i32) -> (i32, i32) {
    %c0_i32 = arith.constant 0 : i32
    %c0_i32_0 = arith.constant 0 : i32
    %c0_i32_1 = arith.constant 0 : i32
    return %c0_i32, %c0_i32_0 : i32, i32
  }
  func.func @transform_4(%arg0: i32) -> (i32, i32) {
    %c0_i32 = arith.constant 0 : i32
    %c0_i32_0 = arith.constant 0 : i32
    %c0_i32_1 = arith.constant 0 : i32
    return %c0_i32, %c0_i32_0 : i32, i32
  }
  func.func @transform_5(%arg0: i32) -> (i32, i32) {
    %c0_i32 = arith.constant 0 : i32
    %c0_i32_0 = arith.constant 0 : i32
    %c0_i32_1 = arith.constant 0 : i32
    return %c0_i32, %c0_i32_0 : i32, i32
  }
  func.func @transform_6(%arg0: i32) -> (i32, i32) {
    %c0_i32 = arith.constant 0 : i32
    %c0_i32_0 = arith.constant 0 : i32
    return %arg0, %c0_i32 : i32, i32
  }
}

</mosaic_0001>

<bundles_post_ra>
// kernel: tpu_custom_call.1
= control target key start
LH: loop header
LB: loop body
LE: loop exit
PB: predicated region body
PF: predicated region fallthrough
CT: control target
= control target key end

     0   :  { %11 = vsyncpa [#allocation3], 0  ;;  %s1074_s0 = inlined_call_operand.hbm [shape: f32[8,64], index: 0, kind: input, shape index: {}]   ;;  %s1075_s1 = inlined_call_operand.hbm [shape: f32[64,128], index: 1, kind: input, shape index: {}]   ;;  %s1076_s2 = inlined_call_operand.hbm [shape: f32[128,128], index: 2, kind: input, shape index: {}]   ;;  %s1077_s3 = inlined_call_operand.hbm [shape: f32[128,128], index: 3, kind: input, shape index: {}]   ;;  %s1078_s4 = inlined_call_operand.hbm [shape: f32[128,128], index: 4, kind: input, shape index: {}]   ;;  %s1079_s5 = inlined_call_operand.vmem [shape: f32[8,128], index: 5, kind: input, shape index: {}]   ;;  %s1080_s6 = inlined_call_operand.hbm [shape: f32[8,128], index: 6, kind: output, shape index: {}]  }
   0x1   :  { %12 = vsyncpa [#allocation6], 0 }
   0x2   :  { %13 = vsyncpa [#allocation9], 0 }
   0x3   :  { %14 = vsyncpa [#allocation4], 0  ;;  %s896_s21 = smov [#allocation5]   ;;  %s756_s25 = scalar_lea.hbm %s1075_s1, 1024 }
   0x4   :  { %s30_s22 = sshll.u32 %s896_s21, 4  ;;  %p757_p0 = scmp.ne.s32.totalorder %s1075_s1, %s756_s25  ;;  %s31_s22 = int_to_ptr.vmem [resolvable:$true] %s30_s22 }
   0x5   :  { %p760_p1 = scmp.lt.u32.totalorder %s756_s25, %s1075_s1 }
   0x7   :  { %p762_p2 = pnand %p760_p1, %p757_p0 }
   0x9   :  { %765 = shalt.err (!%p762_p2)
}
   0xa   :  { %s766_s30 = scalar_lea.vmem %s31_s22, 1024  ;;  %p771_p4 = scmp.lt.s32.totalorder %s31_s22, %s31_s22 }
   0xb   :  { %p767_p3 = scmp.ne.s32.totalorder %s31_s22, %s766_s30  ;;  %p772_p5 = scmp.lt.s32.totalorder %s766_s30, %s766_s30 }
   0xd   :  { %p773_p6 = por %p772_p5, %p771_p4 }
   0xf   :  { %p774_p7 = pnand %p773_p6, %p767_p3 }
  0x11   :  { %777 = shalt.err (!%p774_p7)
}
  0x12   :  { %s897_s7 = smov 128   ;;  %s898_s8 = smov 8  }
  0x13   :  { %36 = dma.hbm_to_vmem [thread:$0]  %s1075_s1, 1024, %s31_s22, [#allocation6], %s897_s7, %s897_s7, %s898_s8  }
  0x14   :  { %s899_s11 = smov [#allocation8]   ;;  %s900_s13 = smov [#allocation2]  }
  0x15   :  { %s54_s12 = sshll.u32 %s899_s11, 4  ;;  %s21_s14 = sshll.u32 %s900_s13, 4  ;;  %s55_s12 = int_to_ptr.vmem [resolvable:$true] %s54_s12  ;;  %s22_s14 = int_to_ptr.vmem [resolvable:$true] %s21_s14 }
  0x16   :  { %s778_s17 = scalar_lea.hbm %s1077_s3, 2048 }
  0x17   :  { %p779_p8 = scmp.ne.s32.totalorder %s1077_s3, %s778_s17  ;;  %p782_p9 = scmp.lt.u32.totalorder %s778_s17, %s1077_s3 }
  0x19   :  { %p784_p10 = pnand %p782_p9, %p779_p8 }
  0x1b   :  { %787 = shalt.err (!%p784_p10)
}
  0x1c   :  { %s788_s1 = scalar_lea.vmem %s55_s12, 2048  ;;  %p793_p12 = scmp.lt.s32.totalorder %s55_s12, %s55_s12 }
  0x1d   :  { %p789_p11 = scmp.ne.s32.totalorder %s55_s12, %s788_s1  ;;  %p794_p13 = scmp.lt.s32.totalorder %s788_s1, %s788_s1 }
  0x1f   :  { %p795_p0 = por %p794_p13, %p793_p12 }
  0x21   :  { %p796_p1 = pnand %p795_p0, %p789_p11 }
  0x23   :  { %799 = shalt.err (!%p796_p1)
}
  0x24   :  { %60 = dma.hbm_to_vmem [thread:$0]  %s1077_s3, 2048, %s55_s12, [#allocation9], %s897_s7, %s897_s7, %s898_s8  }
  0x25   :  { %s800_s26 = scalar_lea.hbm %s1074_s0, 128 }
  0x26   :  { %p801_p2 = scmp.ne.s32.totalorder %s1074_s0, %s800_s26  ;;  %p804_p3 = scmp.lt.u32.totalorder %s800_s26, %s1074_s0 }
  0x28   :  { %p806_p4 = pnand %p804_p3, %p801_p2 }
  0x2a   :  { %809 = shalt.err (!%p806_p4)
}
  0x2b   :  { %s810_s9 = scalar_lea.vmem %s22_s14, 128  ;;  %p815_p6 = scmp.lt.s32.totalorder %s22_s14, %s22_s14 }
  0x2c   :  { %p811_p5 = scmp.ne.s32.totalorder %s22_s14, %s810_s9  ;;  %p816_p7 = scmp.lt.s32.totalorder %s810_s9, %s810_s9 }
  0x2e   :  { %p817_p8 = por %p816_p7, %p815_p6 }
  0x30   :  { %p818_p9 = pnand %p817_p8, %p811_p5 }
  0x32   :  { %821 = shalt.err (!%p818_p9)
}
  0x33   :  { %24 = dma.hbm_to_vmem [thread:$0]  %s1074_s0, 128, %s22_s14, [#allocation3]  }
  0x34   :  { %s901_s11 = smov [#allocation7]   ;;  %s902_s13 = smov [#allocation10]  }
  0x35   :  { %s42_s12 = sshll.u32 %s901_s11, 4  ;;  %s66_s15 = sshll.u32 %s902_s13, 4  ;;  %s43_s12 = int_to_ptr.vmem [resolvable:$true] %s42_s12  ;;  %s67_s15 = int_to_ptr.vmem [resolvable:$true] %s66_s15 }
  0x36   :  { %s822_s18 = scalar_lea.hbm %s1076_s2, 2048 }
  0x37   :  { %p823_p10 = scmp.ne.s32.totalorder %s1076_s2, %s822_s18  ;;  %p826_p11 = scmp.lt.u32.totalorder %s822_s18, %s1076_s2 }
  0x39   :  { %p828_p12 = pnand %p826_p11, %p823_p10 }
  0x3b   :  { %831 = shalt.err (!%p828_p12)
}
  0x3c   :  { %s832_s0 = scalar_lea.vmem %s43_s12, 2048  ;;  %p837_p0 = scmp.lt.s32.totalorder %s43_s12, %s43_s12 }
  0x3d   :  { %p833_p13 = scmp.ne.s32.totalorder %s43_s12, %s832_s0  ;;  %p838_p1 = scmp.lt.s32.totalorder %s832_s0, %s832_s0 }
  0x3f   :  { %p839_p2 = por %p838_p1, %p837_p0 }
  0x41   :  { %p840_p3 = pnand %p839_p2, %p833_p13 }
  0x43   :  { %843 = shalt.err (!%p840_p3)
}
  0x44   :  { %48 = dma.hbm_to_vmem [thread:$0]  %s1076_s2, 2048, %s43_s12, [#allocation6], %s897_s7, %s897_s7, %s898_s8  }
  0x45   :  { %s844_s25 = scalar_lea.hbm %s1078_s4, 2048 }
  0x46   :  { %p845_p4 = scmp.ne.s32.totalorder %s1078_s4, %s844_s25  ;;  %p848_p5 = scmp.lt.u32.totalorder %s844_s25, %s1078_s4 }
  0x48   :  { %p850_p6 = pnand %p848_p5, %p845_p4 }
  0x4a   :  { %853 = shalt.err (!%p850_p6)
}
  0x4b   :  { %s854_s30 = scalar_lea.vmem %s67_s15, 2048  ;;  %p859_p8 = scmp.lt.s32.totalorder %s67_s15, %s67_s15 }
  0x4c   :  { %p855_p7 = scmp.ne.s32.totalorder %s67_s15, %s854_s30  ;;  %p860_p9 = scmp.lt.s32.totalorder %s854_s30, %s854_s30 }
  0x4e   :  { %p861_p10 = por %p860_p9, %p859_p8 }
  0x50   :  { %p862_p11 = pnand %p861_p10, %p855_p7 }
  0x52   :  { %865 = shalt.err (!%p862_p11)
}
  0x53   :  { %72 = dma.hbm_to_vmem [thread:$0]  %s1078_s4, 2048, %s67_s15, [#allocation9], %s897_s7, %s897_s7, %s898_s8  }
  0x54   :  { %888 = dma.done.wait [#allocation3], 128  }
  0x55   :  { %889 = vsyncadd [#allocation3], 4294967168 }
  0x56   :  { %890 = dma.done.wait [#allocation6], 3072  }
  0x57   :  { %891 = vsyncadd [#allocation6], 4294964224 }
  0x58   :  { %892 = dma.done.wait [#allocation9], 4096  }
  0x59   :  { %893 = vsyncadd [#allocation9], 4294963200  ;;  %v903_v0 = vmov 0.0|0.0   ;;  %vm904_vm0 = vmmov 0   ;;  %v905_v1 = vmov 0.0   ;;  %v91_v2 = vld [vmem:[#allocation5] sm:$0xff] }
  0x5a   :  { %661 = vmatprep.subr.bf16.mxu0 %v903_v0  ;;  %553 = vmatprep.mubr.msk.f32.mxu0 %vm904_vm0, %v905_v1  ;;  %v92_v3 = vld [vmem:[#allocation5 + $0x8] sm:$0xff]  ;;  %v93_v4 = vld [vmem:[#allocation5 + $0x10] sm:$0xff]  ;;  %v94_v6 = vld [vmem:[#allocation5 + $0x18] sm:$0xff]  ;;  %vm104_vm1 = vcmask 523264   ;;  %s906_s15 = smov [#allocation11]  }
  0x5b   :  { %673 = vmatprep.subr.bf16.mxu1 %v903_v0  ;;  %588 = vmatprep.mubr.msk.f32.mxu1 %vm904_vm0, %v905_v1  ;;  %v662_v5 = vpack.c.bf16 %v92_v3, %v91_v2  ;;  %v665_v7 = vpack.c.bf16 %v94_v6, %v93_v4  ;;  %v179_v8 = vld [vmem:[#allocation7] sm:$0xff]  ;;  %v180_v9 = vld [vmem:[#allocation7 + $0x8] sm:$0xff]  ;;  %v181_v10 = vld [vmem:[#allocation7 + $0x10] sm:$0xff]  ;;  %s461_s16 = sshll.u32 %s906_s15, 4  ;;  %s462_s16 = int_to_ptr.vmem [resolvable:$true] %s461_s16 }
  0x5c   :  { %v95_v11 = vld [vmem:[#allocation5 + $0x20] sm:$0xff]  ;;  %v96_v12 = vld [vmem:[#allocation5 + $0x28] sm:$0xff]  ;;  %v674_v13 = vpack.c.bf16 %v180_v9, %v179_v8  ;;  %v182_v14 = vld [vmem:[#allocation7 + $0x18] sm:$0xff]  ;;  %s866_s17 = scalar_lea.vmem %s462_s16, 128  ;;  %p871_p13 = scmp.lt.s32.totalorder %s462_s16, %s462_s16 }
  0x5d   :  { %663 = vmatpush3.bf16.msra.mxu0 %v662_v5  ;;  %v677_v15 = vpack.c.bf16 %v182_v14, %v181_v10  ;;  %v668_v16 = vpack.c.bf16 %v96_v12, %v95_v11  ;;  %v183_v17 = vld [vmem:[#allocation7 + $0x20] sm:$0xff]  ;;  %v184_v18 = vld [vmem:[#allocation7 + $0x28] sm:$0xff]  ;;  %v97_v19 = vld [vmem:[#allocation5 + $0x30] sm:$0xff]  ;;  %p867_p12 = scmp.ne.s32.totalorder %s462_s16, %s866_s17  ;;  %p872_p0 = scmp.lt.s32.totalorder %s866_s17, %s866_s17 }
  0x5e   :  { %664 = vmatprep.subr.bf16.mxu0 %v903_v0  ;;  %675 = vmatpush3.bf16.msra.mxu1 %v674_v13  ;;  %v98_v20 = vld [vmem:[#allocation5 + $0x38] sm:$0xff]  ;;  %v680_v21 = vpack.c.bf16 %v184_v18, %v183_v17  ;;  %v185_v23 = vld [vmem:[#allocation7 + $0x30] sm:$0xff]  ;;  %v187_v27 = vld [vmem:[#allocation7 + $0x40] sm:$0xff] }
  0x5f   :  { %676 = vmatprep.subr.bf16.mxu1 %v903_v0  ;;  %v671_v22 = vpack.c.bf16 %v98_v20, %v97_v19  ;;  %v186_v24 = vld [vmem:[#allocation7 + $0x38] sm:$0xff]  ;;  %v188_v28 = vld [vmem:[#allocation7 + $0x48] sm:$0xff]  ;;  %v189_v30 = vld [vmem:[#allocation7 + $0x50] sm:$0xff]  ;;  %p873_p1 = por %p872_p0, %p871_p13 }
  0x60   :  { %v683_v25 = vpack.c.bf16 %v186_v24, %v185_v23  ;;  %v90_v26 = vld [vmem:[#allocation2] sm:$0xff]  ;;  %v686_v29 = vpack.c.bf16 %v188_v28, %v187_v27  ;;  %v191_v33 = vld [vmem:[#allocation7 + $0x60] sm:$0xff]  ;;  %v192_v34 = vld [vmem:[#allocation7 + $0x68] sm:$0xff] }
  0x61   :  { %666 = vmatpush3.bf16.msra.mxu0 %v665_v7  ;;  %v190_v31 = vld [vmem:[#allocation7 + $0x58] sm:$0xff]  ;;  %v692_v35 = vpack.c.bf16 %v192_v34, %v191_v33  ;;  %v193_v36 = vld [vmem:[#allocation7 + $0x70] sm:$0xff]  ;;  %v271_v39 = vld [vmem:[#allocation8] sm:$0xff]  ;;  %p874_p2 = pnand %p873_p1, %p867_p12 }
  0x62   :  { %667 = vmatprep.subr.bf16.mxu0 %v903_v0  ;;  %678 = vmatpush3.bf16.msra.mxu1 %v677_v15  ;;  %v689_v32 = vpack.c.bf16 %v190_v31, %v189_v30  ;;  %v194_v37 = vld [vmem:[#allocation7 + $0x78] sm:$0xff]  ;;  %v272_v40 = vld [vmem:[#allocation8 + $0x8] sm:$0xff]  ;;  %v273_v41 = vld [vmem:[#allocation8 + $0x10] sm:$0xff] }
  0x63   :  { %679 = vmatprep.subr.bf16.mxu1 %v903_v0  ;;  %v695_v38 = vpack.c.bf16 %v194_v37, %v193_v36  ;;  %v698_v42 = vpack.c.bf16 %v272_v40, %v271_v39  ;;  %v274_v43 = vld [vmem:[#allocation8 + $0x18] sm:$0xff]  ;;  %v275_v45 = vld [vmem:[#allocation8 + $0x20] sm:$0xff]  ;;  %v276_v46 = vld [vmem:[#allocation8 + $0x28] sm:$0xff] }
  0x64   :  { %v701_v44 = vpack.c.bf16 %v274_v43, %v273_v41  ;;  %v704_v47 = vpack.c.bf16 %v276_v46, %v275_v45  ;;  %v277_v48 = vld [vmem:[#allocation8 + $0x30] sm:$0xff]  ;;  %v278_v49 = vld [vmem:[#allocation8 + $0x38] sm:$0xff]  ;;  %v279_v51 = vld [vmem:[#allocation8 + $0x40] sm:$0xff] }
  0x65   :  { %669 = vmatpush3.bf16.msra.mxu0 %v668_v16  ;;  %v707_v50 = vpack.c.bf16 %v278_v49, %v277_v48  ;;  %v280_v52 = vld [vmem:[#allocation8 + $0x48] sm:$0xff]  ;;  %v281_v54 = vld [vmem:[#allocation8 + $0x50] sm:$0xff]  ;;  %v282_v55 = vld [vmem:[#allocation8 + $0x58] sm:$0xff] }
  0x66   :  { %670 = vmatprep.subr.bf16.mxu0 %v903_v0  ;;  %681 = vmatpush3.bf16.msra.mxu1 %v680_v21  ;;  %v710_v53 = vpack.c.bf16 %v280_v52, %v279_v51  ;;  %v713_v56 = vpack.c.bf16 %v282_v55, %v281_v54  ;;  %v283_v57 = vld [vmem:[#allocation8 + $0x60] sm:$0xff]  ;;  %v284_v58 = vld [vmem:[#allocation8 + $0x68] sm:$0xff]  ;;  %v472_v60 = vld [vmem:[%s1079_s5] ss:$0 sm:$0xff] }
  0x67   :  { %682 = vmatprep.subr.bf16.mxu1 %v903_v0  ;;  %v716_v59 = vpack.c.bf16 %v284_v58, %v283_v57  ;;  %v285_v3 = vld [vmem:[#allocation8 + $0x70] sm:$0xff]  ;;  %v286_v4 = vld [vmem:[#allocation8 + $0x78] sm:$0xff]  ;;  %v363_v6 = vld [vmem:[#allocation10] sm:$0xff] }
  0x68   :  { %v719_v5 = vpack.c.bf16 %v286_v4, %v285_v3  ;;  %v364_v7 = vld [vmem:[#allocation10 + $0x8] sm:$0xff]  ;;  %v365_v8 = vld [vmem:[#allocation10 + $0x10] sm:$0xff]  ;;  %v366_v10 = vld [vmem:[#allocation10 + $0x18] sm:$0xff] }
  0x69   :  { %672 = vmatpush3.bf16.msra.mxu0 %v671_v22  ;;  %v722_v9 = vpack.c.bf16 %v364_v7, %v363_v6  ;;  %v725_v11 = vpack.c.bf16 %v366_v10, %v365_v8  ;;  %v367_v12 = vld [vmem:[#allocation10 + $0x20] sm:$0xff]  ;;  %v368_v13 = vld [vmem:[#allocation10 + $0x28] sm:$0xff]  ;;  %v370_v15 = vld [vmem:[#allocation10 + $0x38] sm:$0xff] }
  0x6a   :  { %697 = vmatprep.subr.bf16.mxu0 %v903_v0  ;;  %684 = vmatpush3.bf16.msra.mxu1 %v683_v25  ;;  %v728_v14 = vpack.c.bf16 %v368_v13, %v367_v12  ;;  %v371_v17 = vld [vmem:[#allocation10 + $0x40] sm:$0xff]  ;;  %v372_v18 = vld [vmem:[#allocation10 + $0x48] sm:$0xff]  ;;  %v373_v20 = vld [vmem:[#allocation10 + $0x50] sm:$0xff] }
  0x6b   :  { %685 = vmatprep.subr.bf16.mxu1 %v903_v0  ;;  %v734_v19 = vpack.c.bf16 %v372_v18, %v371_v17  ;;  %v374_v21 = vld [vmem:[#allocation10 + $0x58] sm:$0xff]  ;;  %v375_v23 = vld [vmem:[#allocation10 + $0x60] sm:$0xff]  ;;  %v376_v24 = vld [vmem:[#allocation10 + $0x68] sm:$0xff] }
  0x6c   :  { %554 = vmatmul.mubr.msk.f32.vlgmr.msra.gmra.mrb[0].mxu0 %vm104_vm1, %v90_v26  ;;  %v737_v22 = vpack.c.bf16 %v374_v21, %v373_v20  ;;  %v740_v25 = vpack.c.bf16 %v376_v24, %v375_v23  ;;  %v474_v26 = vld [vmem:[%s1079_s5 + $0x1] ss:$0 sm:$0xff]  ;;  %v377_v31 = vld [vmem:[#allocation10 + $0x70] sm:$0xff]  ;;  %v475_v34 = vld [vmem:[%s1079_s5 + $0x2] ss:$0 sm:$0xff] }
  0x6d   :  { %623 = vmatprep.mubr.msk.f32.mxu0 %vm904_vm0, %v905_v1  ;;  %699 = vmatpush3.bf16.msra.mxu0 %v698_v42 }
  0x6e   :  { %687 = vmatpush3.bf16.msra.mxu1 %v686_v29  ;;  %700 = vmatprep.subr.bf16.mxu0 %v903_v0 }
  0x6f   :  { %688 = vmatprep.subr.bf16.mxu1 %v903_v0 }
  0x71   :  { %702 = vmatpush3.bf16.msra.mxu0 %v701_v44 }
  0x72   :  { %690 = vmatpush3.bf16.msra.mxu1 %v689_v32  ;;  %703 = vmatprep.subr.bf16.mxu0 %v903_v0  ;;  %v378_v32 = vld [vmem:[#allocation10 + $0x78] sm:$0xff] }
  0x73   :  { %691 = vmatprep.subr.bf16.mxu1 %v903_v0  ;;  %v743_v33 = vpack.c.bf16 %v378_v32, %v377_v31 }
  0x75   :  { %705 = vmatpush3.bf16.msra.mxu0 %v704_v47 }
  0x76   :  { %693 = vmatpush3.bf16.msra.mxu1 %v692_v35  ;;  %706 = vmatprep.subr.bf16.mxu0 %v903_v0 }
  0x77   :  { %694 = vmatprep.subr.bf16.mxu1 %v903_v0 }
  0x79   :  { %708 = vmatpush3.bf16.msra.mxu0 %v707_v50 }
  0x7a   :  { %696 = vmatpush3.bf16.msra.mxu1 %v695_v38  ;;  %709 = vmatprep.subr.bf16.mxu0 %v903_v0  ;;  %v476_v38 = vld [vmem:[%s1079_s5 + $0x3] ss:$0 sm:$0xff] }
  0x7b   :  { %721 = vmatprep.subr.bf16.mxu1 %v903_v0 }
  0x7d   :  { %711 = vmatpush3.bf16.msra.mxu0 %v710_v53 }
  0x7e   :  { %712 = vmatprep.subr.bf16.mxu0 %v903_v0 }
  0x81   :  { %714 = vmatpush3.bf16.msra.mxu0 %v713_v56 }
  0x82   :  { %715 = vmatprep.subr.bf16.mxu0 %v903_v0 }
  0x85   :  { %717 = vmatpush3.bf16.msra.mxu0 %v716_v59 }
  0x86   :  { %718 = vmatprep.subr.bf16.mxu0 %v903_v0 }
  0x89   :  { %720 = vmatpush3.bf16.msra.mxu0 %v719_v5 }
 0x13f   :  { %v174_v61 = vpop.f32.mrb[0].mxu0 }
 0x140   :  { %v175_v62 = vadd.f32 %v472_v60, %v174_v61  ;;  %v555_v63 = vpop.f32.mrb[1].mxu0 }
 0x142   :  { %v178_v2 = vmax.f32 %v175_v62, 0.0 }
 0x144   :  { %589 = vmatmul.mubr.f32.vlgmr.msra.gmra.mrb[0].mxu1 %v178_v2 }
 0x145   :  { %658 = vmatprep.mubr.msk.f32.mxu1 %vm904_vm0, %v905_v1  ;;  %723 = vmatpush3.bf16.msra.mxu1 %v722_v9  ;;  %v369_v1 = vld [vmem:[#allocation10 + $0x30] sm:$0xff] }
 0x146   :  { %724 = vmatprep.subr.bf16.mxu1 %v903_v0  ;;  %v731_v16 = vpack.c.bf16 %v370_v15, %v369_v1 }
 0x149   :  { %726 = vmatpush3.bf16.msra.mxu1 %v725_v11 }
 0x14a   :  { %727 = vmatprep.subr.bf16.mxu1 %v903_v0 }
 0x14d   :  { %729 = vmatpush3.bf16.msra.mxu1 %v728_v14 }
 0x14e   :  { %730 = vmatprep.subr.bf16.mxu1 %v903_v0 }
 0x151   :  { %732 = vmatpush3.bf16.msra.mxu1 %v731_v16 }
 0x152   :  { %733 = vmatprep.subr.bf16.mxu1 %v903_v0 }
 0x155   :  { %735 = vmatpush3.bf16.msra.mxu1 %v734_v19 }
 0x156   :  { %736 = vmatprep.subr.bf16.mxu1 %v903_v0 }
 0x159   :  { %738 = vmatpush3.bf16.msra.mxu1 %v737_v22 }
 0x15a   :  { %739 = vmatprep.subr.bf16.mxu1 %v903_v0 }
 0x15d   :  { %741 = vmatpush3.bf16.msra.mxu1 %v740_v25 }
 0x15e   :  { %742 = vmatprep.subr.bf16.mxu1 %v903_v0 }
 0x161   :  { %744 = vmatpush3.bf16.msra.mxu1 %v743_v33 }
 0x217   :  { %v266_v27 = vpop.f32.mrb[0].mxu1 }
 0x218   :  { %v267_v28 = vadd.f32 %v474_v26, %v266_v27  ;;  %v590_v29 = vpop.f32.mrb[1].mxu1 }
 0x21a   :  { %v270_v30 = vmax.f32 %v267_v28, 0.0 }
 0x21c   :  { %624 = vmatmul.mubr.f32.vlgmr.msra.gmra.mrb[2].mxu0 %v270_v30 }
 0x2ef   :  { %v358_v35 = vpop.f32.mrb[2].mxu0 }
 0x2f0   :  { %v359_v36 = vadd.f32 %v475_v34, %v358_v35  ;;  %v625_v0 = vpop.f32.mrb[3].mxu0 }
 0x2f2   :  { %v362_v37 = vmax.f32 %v359_v36, 0.0 }
 0x2f4   :  { %659 = vmatmul.mubr.f32.vlgmr.msra.gmra.mrb[2].mxu1 %v362_v37 }
 0x3c7   :  { %v450_v39 = vpop.f32.mrb[2].mxu1 }
 0x3c8   :  { %v451_v40 = vadd.f32 %v476_v38, %v450_v39  ;;  %v660_v41 = vpop.f32.mrb[3].mxu1 }
 0x3ca   :  { %454 = vst [vmem:[#allocation11] sm:$0xff] %v451_v40 }
 0x3cb   :  { %877 = shalt.err (!%p874_p2)
}
 0x3cc   :  { %s878_s20 = scalar_lea.hbm %s1080_s6, 128 }
 0x3cd   :  { %p879_p3 = scmp.ne.s32.totalorder %s1080_s6, %s878_s20  ;;  %p882_p4 = scmp.lt.u32.totalorder %s878_s20, %s1080_s6 }
 0x3cf   :  { %p884_p5 = pnand %p882_p4, %p879_p3 }
 0x3d1   :  { %887 = shalt.err (!%p884_p5)
}
 0x3d2   :  { %464 = dma.vmem_to_hbm [thread:$0]  %s462_s16, 128, %s1080_s6, [#allocation4]  }
 0x3d3   :  { %894 = dma.done.wait [#allocation4], 128  }
 0x3d4   :  { %895 = vsyncadd [#allocation4], 4294967168 }
 0x3d5   :  { %468 = vsyncpa [#allocation3], 1 }
 0x3d6   :  { %469 = vsyncpa [#allocation6], 1 }
 0x3d7   :  { %470 = vsyncpa [#allocation9], 1 }
 0x3d8   :  { %471 = vsyncpa [#allocation4], 1 }

</bundles_post_ra>
